<compile_context>
chip_gen: v6e
topology: v6e:2x2x1
jax: 0.10.0
libtpu: 0.0.40
codegen_flags: <defaults>
</compile_context>

<pallas_src>
import jax
import jax.numpy as jnp
from jax.experimental import pallas as pl
from jax.experimental.pallas import tpu as pltpu

HIDDEN_DIM = 32
EMB_DIM = 768
TYPE_DIM = 8
IN_DIM = EMB_DIM * 2 + TYPE_DIM * 2  # 1552
BN_EPS = 1e-5


def _round_up(x, m):
    return ((x + m - 1) // m) * m


def _batch_tile_cap():
    """Generation-aware batch-tile cap for f32 activations.

    Double-buffered f32 emb tiles cost 2 inputs * 2 buffers * tb*768*4 B:
      tb=1024 -> ~12 MiB  (fits v5e's 16 MiB scoped-VMEM default)
      tb=2048 -> ~24 MiB  (fits v6e/v7x's 32 MiB scoped default, 64 MiB v7x phys)
    """
    try:
        kind = jax.devices()[0].device_kind.lower()
    except Exception:
        return 1024
    if "v6" in kind or "v7" in kind:
        return 2048
    return 1024


def _pick_batch_tile(batch):
    if batch <= 256:
        # Single tile; block == full batch dim, so the (8,128) sublane rule is
        # satisfied for any batch size and no padding copy is ever needed.
        return batch
    # >= 2 tiles so the "parallel" grid axis can use both v7x TensorCores;
    # tiles are multiples of 128 to keep the [1, tb] output block lane-dense.
    cap = _batch_tile_cap()
    return min(cap, _round_up(pl.cdiv(batch, 2), 128))


def head_kernel(emb1_ref, emb2_ref, ct_ref, w1a_ref, w1b_ref, base_ref,
                d1_ref, d2_ref, w2_ref, b2_ref, out_ref):
    """One batch tile of sigmoid(fc2(relu(bn1(fc1(x))))) with BN/bias folded.

    emb1_ref: [tb, 768] f32   first pooler embedding (cast to bf16 in-kernel)
    emb2_ref: [tb, 768] f32   second pooler embedding
    ct_ref:   [tb, 2]   f32   (cell_type1, cell_type2) as 0.0 / 1.0
    w1a_ref:  [768, H]  bf16  fc1 rows for emb1 (BN scale folded in)
    w1b_ref:  [768, H]  bf16  fc1 rows for emb2 (BN scale folded in)
    base_ref: [1, H]    f32   fc1 bias + BN shift + type-emb[0] contributions
    d1_ref:   [1, H]    f32   (type-emb[1] - type-emb[0]) contribution, stream 1
    d2_ref:   [1, H]    f32   same, stream 2
    w2_ref:   [1, H]    f32   fc2 weight (row vector)
    b2_ref:   [1, 1]    f32   fc2 bias (SMEM scalar)
    out_ref:  [1, tb]   f32   lane-dense sigmoid outputs for this tile
    """
    # fc1: two K=768-aligned MXU matmuls (bf16 operands, f32 accumulation).
    # The f32->bf16 casts are VPU work hidden under the HBM DMA (mem-bound op).
    h = jnp.dot(emb1_ref[...].astype(jnp.bfloat16), w1a_ref[...],
                preferred_element_type=jnp.float32)
    h = h + jnp.dot(emb2_ref[...].astype(jnp.bfloat16), w1b_ref[...],
                    preferred_element_type=jnp.float32)

    # Folded bias + per-row cell-type contribution:
    #   type_c[ct] = type_c[0] + ct * (type_c[1] - type_c[0]),  ct in {0, 1}.
    ct = ct_ref[...]                                   # [tb, 2]
    h = h + base_ref[...]                              # [1, H] sublane broadcast
    h = h + ct[:, 0:1] * d1_ref[...]                   # [tb,1]*[1,H] -> [tb,H]
    h = h + ct[:, 1:2] * d2_ref[...]

    # ReLU (dropout is identity in eval mode).
    h = jnp.maximum(h, 0.0)

    # fc2 (H -> 1) on the VPU: multiply + lane reduce (skips a 32x1 MXU round
    # trip), sigmoid on the EUP, lane-dense [1, tb] store.
    y = jnp.sum(h * w2_ref[...], axis=-1)              # [tb]
    y = y.reshape(1, -1) + b2_ref[0, 0]                # [1, tb] + SMEM scalar
    out_ref[...] = jax.nn.sigmoid(y)


def order_prediction_head(emb1, emb2, cell_types, folded):
    """emb1/emb2: [B, 768] f32, cell_types: [B, 2] f32 (0/1). Returns [B] f32."""
    batch = emb1.shape[0]
    hidden = folded["w1a"].shape[1]
    tb = _pick_batch_tile(batch)
    num_tiles = pl.cdiv(batch, tb)

    compiler_kwargs = {}
    if tb > 512:
        # Double-buffered f32 emb tiles + (tb,2)->(tb,128)-padded ct tiles,
        # plus headroom for resident weights / output / scratch.  Explicit so
        # tb=1024 works on v5e's 16 MiB scoped default and tb=2048 stays safe
        # against v7x's 64 MiB physical VMEM.
        emb_bytes = 2 * 2 * tb * EMB_DIM * 4
        ct_bytes = 2 * tb * 128 * 4
        compiler_kwargs["vmem_limit_bytes"] = emb_bytes + ct_bytes + (4 << 20)

    out = pl.pallas_call(
        head_kernel,
        out_shape=jax.ShapeDtypeStruct((1, batch), jnp.float32),
        grid=(num_tiles,),
        in_specs=[
            pl.BlockSpec((tb, EMB_DIM), lambda i: (i, 0)),      # emb1 tile (f32)
            pl.BlockSpec((tb, EMB_DIM), lambda i: (i, 0)),      # emb2 tile (f32)
            pl.BlockSpec((tb, 2), lambda i: (i, 0)),            # cell-type tile
            pl.BlockSpec((EMB_DIM, hidden), lambda i: (0, 0)),  # w1a (resident)
            pl.BlockSpec((EMB_DIM, hidden), lambda i: (0, 0)),  # w1b (resident)
            pl.BlockSpec((1, hidden), lambda i: (0, 0)),        # base (resident)
            pl.BlockSpec((1, hidden), lambda i: (0, 0)),        # d1 (resident)
            pl.BlockSpec((1, hidden), lambda i: (0, 0)),        # d2 (resident)
            pl.BlockSpec((1, hidden), lambda i: (0, 0)),        # w2 (resident)
            pl.BlockSpec(memory_space=pltpu.MemorySpace.SMEM),  # b2 scalar
        ],
        out_specs=pl.BlockSpec((1, tb), lambda i: (0, i)),
        compiler_params=pltpu.CompilerParams(
            dimension_semantics=("parallel",), **compiler_kwargs),
    )(emb1, emb2, cell_types,
      folded["w1a"], folded["w1b"], folded["base"], folded["d1"],
      folded["d2"], folded["w2"], folded["b2"])

    return out[0]


def order_prediction_forward(emb1, cell_type1, emb2, cell_type2, folded):
    """Embeddings go straight to the kernel (no cast/pad staging copies);
    only the tiny 8 B/row cell-type repack happens in plain JAX."""
    cell_types = jnp.stack([cell_type1, cell_type2], axis=1).astype(jnp.float32)
    return order_prediction_head(emb1, emb2, cell_types, folded)


def fold_params(params):
    """Host-side one-time prep: fold BN (eval mode) into fc1 (in f32), split
    fc1 by input stream, precompute the type-embedding contribution constants,
    cast only the MXU weight operands to bf16."""
    s = params["bn1_gamma"] * jax.lax.rsqrt(params["bn1_var"] + BN_EPS)  # [H]
    w1 = params["fc1_w"] * s[None, :]                                    # [1552,H]
    b1 = (params["fc1_b"] - params["bn1_mean"]) * s + params["bn1_beta"]  # [H]

    w1a = w1[:EMB_DIM]                                        # emb1 rows
    w1t1 = w1[EMB_DIM:EMB_DIM + TYPE_DIM]                     # type_emb1 rows
    w1b = w1[EMB_DIM + TYPE_DIM:2 * EMB_DIM + TYPE_DIM]       # emb2 rows
    w1t2 = w1[2 * EMB_DIM + TYPE_DIM:]                        # type_emb2 rows

    type_c1 = params["type_embedding"] @ w1t1                 # [2, H]
    type_c2 = params["type_embedding"] @ w1t2                 # [2, H]

    hidden = w1.shape[1]
    base = b1 + type_c1[0] + type_c2[0]                       # [H]
    d1 = type_c1[1] - type_c1[0]                              # [H]
    d2 = type_c2[1] - type_c2[0]                              # [H]

    # NOTE: if real checkpoints had extreme BN running stats, keep w1a/w1b in
    # f32 (kernel is HBM-bound; MXU precision is not the bottleneck).
    return dict(
        w1a=w1a.astype(jnp.bfloat16),
        w1b=w1b.astype(jnp.bfloat16),
        base=base.reshape(1, hidden).astype(jnp.float32),
        d1=d1.reshape(1, hidden).astype(jnp.float32),
        d2=d2.reshape(1, hidden).astype(jnp.float32),
        w2=params["fc2_w"].astype(jnp.float32),                # [1, H]
        b2=params["fc2_b"].reshape(1, 1).astype(jnp.float32),  # [1, 1]
    )


def init_params(key, hidden_dim=HIDDEN_DIM):
    """Deterministic init mirroring the PyTorch module's parameter shapes."""
    k_type, k_w1, k_b1, k_w2, k_b2 = jax.random.split(key, 5)

    # nn.Embedding(2, 8): N(0, 1)
    type_embedding = jax.random.normal(k_type, (2, TYPE_DIM), jnp.float32)

    # nn.Linear(1552, hidden_dim): U(-1/sqrt(fan_in), 1/sqrt(fan_in))
    bound1 = 1.0 / jnp.sqrt(jnp.float32(IN_DIM))
    fc1_w = jax.random.uniform(k_w1, (IN_DIM, hidden_dim), jnp.float32,
                               -bound1, bound1)
    fc1_b = jax.random.uniform(k_b1, (hidden_dim,), jnp.float32,
                               -bound1, bound1)

    # nn.BatchNorm1d(hidden_dim): gamma=1, beta=0, running_mean=0, running_var=1
    bn1_gamma = jnp.ones((hidden_dim,), jnp.float32)
    bn1_beta = jnp.zeros((hidden_dim,), jnp.float32)
    bn1_mean = jnp.zeros((hidden_dim,), jnp.float32)
    bn1_var = jnp.ones((hidden_dim,), jnp.float32)

    # nn.Linear(hidden_dim, 1)
    bound2 = 1.0 / jnp.sqrt(jnp.float32(hidden_dim))
    fc2_w = jax.random.uniform(k_w2, (1, hidden_dim), jnp.float32,
                               -bound2, bound2)
    fc2_b = jax.random.uniform(k_b2, (1,), jnp.float32, -bound2, bound2)

    return dict(type_embedding=type_embedding,
                fc1_w=fc1_w, fc1_b=fc1_b,
                bn1_gamma=bn1_gamma, bn1_beta=bn1_beta,
                bn1_mean=bn1_mean, bn1_var=bn1_var,
                fc2_w=fc2_w, fc2_b=fc2_b)


def reference_forward(emb1, cell_type1, emb2, cell_type2, params):
    """Plain-JAX f32 reference of the PyTorch head (eval mode)."""
    te1 = params["type_embedding"][cell_type1]
    te2 = params["type_embedding"][cell_type2]
    x = jnp.concatenate([emb1, te1, emb2, te2], axis=1)
    h = x @ params["fc1_w"] + params["fc1_b"]
    inv_std = jax.lax.rsqrt(params["bn1_var"] + BN_EPS)
    h = (h - params["bn1_mean"]) * inv_std * params["bn1_gamma"] \
        + params["bn1_beta"]
    h = jnp.maximum(h, 0.0)
    y = h @ params["fc2_w"].T + params["fc2_b"]
    return jax.nn.sigmoid(y)[:, 0]


if __name__ == "__main__":
    B = 4
    key = jax.random.PRNGKey(0)
    k_params, k_e1, k_e2, k_t1, k_t2 = jax.random.split(key, 5)

    params = init_params(k_params)
    folded = fold_params(params)

    # Stand-ins for the pretrained encoders' pooler outputs ([B, 768] each).
    emb1 = jax.random.normal(k_e1, (B, EMB_DIM), jnp.float32)
    emb2 = jax.random.normal(k_e2, (B, EMB_DIM), jnp.float32)
    cell_type1 = jax.random.randint(k_t1, (B,), 0, 2, jnp.int32)
    cell_type2 = jax.random.randint(k_t2, (B,), 0, 2, jnp.int32)

    out = order_prediction_forward(emb1, cell_type1, emb2, cell_type2, folded)
    out = jax.block_until_ready(out)

    ref = reference_forward(emb1, cell_type1, emb2, cell_type2, params)

    assert out.shape == (B,)
    assert bool(jnp.all(jnp.isfinite(out)))
    assert bool(jnp.all((out >= 0.0) & (out <= 1.0)))
    # bf16 matmul operands with f32 accumulation -> loose tolerance.
    assert bool(jnp.allclose(out, ref, atol=1e-2, rtol=1e-2))
    print("KERNEL_OK")
</pallas_src>

<mosaic_0001>
module attributes {stable_mosaic.version = 11 : i64} {
  func.func @head_kernel(%arg0: i32, %arg1: memref<4x768xf32, #tpu.memory_space<vmem>>, %arg2: memref<4x768xf32, #tpu.memory_space<vmem>>, %arg3: memref<4x2xf32, #tpu.memory_space<vmem>>, %arg4: memref<768x32xbf16, #tpu.memory_space<vmem>>, %arg5: memref<768x32xbf16, #tpu.memory_space<vmem>>, %arg6: memref<1x32xf32, #tpu.memory_space<vmem>>, %arg7: memref<1x32xf32, #tpu.memory_space<vmem>>, %arg8: memref<1x32xf32, #tpu.memory_space<vmem>>, %arg9: memref<1x32xf32, #tpu.memory_space<vmem>>, %arg10: memref<1x1xf32, #tpu.memory_space<smem>>, %arg11: memref<1x4xf32, #tpu.memory_space<vmem>>) attributes {dimension_semantics = [#tpu.dimension_semantics<parallel>], iteration_bounds = array<i64: 1>, scalar_prefetch = 0 : i64, scratch_operands = 0 : i64, tpu.core_type = #tpu.core_type<tc>, window_params = [{transform_indices = @transform_0, window_bounds = array<i64: 4, 768>}, {transform_indices = @transform_1, window_bounds = array<i64: 4, 768>}, {transform_indices = @transform_2, window_bounds = array<i64: 4, 2>}, {pipeline_mode = #tpu.pipeline_mode<synchronous>, transform_indices = @transform_3, window_bounds = array<i64: 768, 32>}, {pipeline_mode = #tpu.pipeline_mode<synchronous>, transform_indices = @transform_4, window_bounds = array<i64: 768, 32>}, {pipeline_mode = #tpu.pipeline_mode<synchronous>, transform_indices = @transform_5, window_bounds = array<i64: 1, 32>}, {pipeline_mode = #tpu.pipeline_mode<synchronous>, transform_indices = @transform_6, window_bounds = array<i64: 1, 32>}, {pipeline_mode = #tpu.pipeline_mode<synchronous>, transform_indices = @transform_7, window_bounds = array<i64: 1, 32>}, {pipeline_mode = #tpu.pipeline_mode<synchronous>, transform_indices = @transform_8, window_bounds = array<i64: 1, 32>}, {transform_indices = @transform_9, window_bounds = array<i64: 1, 1>}, {transform_indices = @transform_10, window_bounds = array<i64: 1, 4>}]} {
    %c0 = arith.constant 0 : index
    %c0_0 = arith.constant 0 : index
    %0 = vector.load %arg1[%c0, %c0_0] : memref<4x768xf32, #tpu.memory_space<vmem>>, vector<4x768xf32>
    %1 = arith.truncf %0 : vector<4x768xf32> to vector<4x768xbf16>
    %c0_1 = arith.constant 0 : index
    %c0_2 = arith.constant 0 : index
    %2 = vector.load %arg4[%c0_1, %c0_2] : memref<768x32xbf16, #tpu.memory_space<vmem>>, vector<768x32xbf16>
    %cst = arith.constant dense<0.000000e+00> : vector<4x32xf32>
    %3 = tpu.matmul %1, %2, %cst {dimension_numbers = #tpu.dot_dimension_numbers<[1], [0], [0], [1], [0, 0, 1, 1], [], []>} : vector<4x768xbf16>, vector<768x32xbf16>, vector<4x32xf32> -> vector<4x32xf32>
    %c0_3 = arith.constant 0 : index
    %c0_4 = arith.constant 0 : index
    %4 = vector.load %arg2[%c0_3, %c0_4] : memref<4x768xf32, #tpu.memory_space<vmem>>, vector<4x768xf32>
    %5 = arith.truncf %4 : vector<4x768xf32> to vector<4x768xbf16>
    %c0_5 = arith.constant 0 : index
    %c0_6 = arith.constant 0 : index
    %6 = vector.load %arg5[%c0_5, %c0_6] : memref<768x32xbf16, #tpu.memory_space<vmem>>, vector<768x32xbf16>
    %cst_7 = arith.constant dense<0.000000e+00> : vector<4x32xf32>
    %7 = tpu.matmul %5, %6, %cst_7 {dimension_numbers = #tpu.dot_dimension_numbers<[1], [0], [0], [1], [0, 0, 1, 1], [], []>} : vector<4x768xbf16>, vector<768x32xbf16>, vector<4x32xf32> -> vector<4x32xf32>
    %8 = arith.addf %3, %7 : vector<4x32xf32>
    %c0_8 = arith.constant 0 : index
    %c0_9 = arith.constant 0 : index
    %9 = vector.load %arg3[%c0_8, %c0_9] : memref<4x2xf32, #tpu.memory_space<vmem>>, vector<4x2xf32>
    %c0_10 = arith.constant 0 : index
    %c0_11 = arith.constant 0 : index
    %10 = vector.load %arg6[%c0_10, %c0_11] : memref<1x32xf32, #tpu.memory_space<vmem>>, vector<1x32xf32>
    %11 = vector.broadcast %10 : vector<1x32xf32> to vector<4x32xf32>
    %12 = arith.addf %8, %11 : vector<4x32xf32>
    %13 = vector.extract_strided_slice %9 {offsets = [0, 0], sizes = [4, 1], strides = [1, 1]} : vector<4x2xf32> to vector<4x1xf32>
    %c0_12 = arith.constant 0 : index
    %c0_13 = arith.constant 0 : index
    %14 = vector.load %arg7[%c0_12, %c0_13] : memref<1x32xf32, #tpu.memory_space<vmem>>, vector<1x32xf32>
    %15 = vector.broadcast %13 : vector<4x1xf32> to vector<4x32xf32>
    %16 = vector.broadcast %14 : vector<1x32xf32> to vector<4x32xf32>
    %17 = arith.mulf %15, %16 : vector<4x32xf32>
    %18 = arith.addf %12, %17 : vector<4x32xf32>
    %19 = vector.extract_strided_slice %9 {offsets = [0, 1], sizes = [4, 1], strides = [1, 1]} : vector<4x2xf32> to vector<4x1xf32>
    %c0_14 = arith.constant 0 : index
    %c0_15 = arith.constant 0 : index
    %20 = vector.load %arg8[%c0_14, %c0_15] : memref<1x32xf32, #tpu.memory_space<vmem>>, vector<1x32xf32>
    %21 = vector.broadcast %19 : vector<4x1xf32> to vector<4x32xf32>
    %22 = vector.broadcast %20 : vector<1x32xf32> to vector<4x32xf32>
    %23 = arith.mulf %21, %22 : vector<4x32xf32>
    %24 = arith.addf %18, %23 : vector<4x32xf32>
    %cst_16 = arith.constant 0.000000e+00 : f32
    %25 = vector.broadcast %cst_16 : f32 to vector<4x32xf32>
    %26 = arith.maximumf %24, %25 : vector<4x32xf32>
    %c0_17 = arith.constant 0 : index
    %c0_18 = arith.constant 0 : index
    %27 = vector.load %arg9[%c0_17, %c0_18] : memref<1x32xf32, #tpu.memory_space<vmem>>, vector<1x32xf32>
    %28 = vector.broadcast %27 : vector<1x32xf32> to vector<4x32xf32>
    %29 = arith.mulf %26, %28 : vector<4x32xf32>
    %cst_19 = arith.constant dense<0.000000e+00> : vector<4xf32>
    %30 = vector.multi_reduction <add>, %29, %cst_19 [1] : vector<4x32xf32> to vector<4xf32>
    %31 = vector.shape_cast %30 : vector<4xf32> to vector<1x4xf32>
    %c0_20 = arith.constant 0 : index
    %c0_21 = arith.constant 0 : index
    %32 = memref.load %arg10[%c0_20, %c0_21] : memref<1x1xf32, #tpu.memory_space<smem>>
    %33 = vector.broadcast %32 : f32 to vector<1x4xf32>
    %34 = arith.addf %31, %33 : vector<1x4xf32>
    %35 = arith.negf %34 : vector<1x4xf32>
    %36 = math.exp %35 : vector<1x4xf32>
    %cst_22 = arith.constant 1.000000e+00 : f32
    %37 = vector.broadcast %cst_22 : f32 to vector<1x4xf32>
    %38 = arith.addf %37, %36 : vector<1x4xf32>
    %39 = arith.divf %37, %38 : vector<1x4xf32>
    %c0_23 = arith.constant 0 : index
    %c0_24 = arith.constant 0 : index
    %40 = vector.load %arg11[%c0_23, %c0_24] : memref<1x4xf32, #tpu.memory_space<vmem>>, vector<1x4xf32>
    tpu.vector_store %arg11[%c0_23, %c0_24], %39 {strides = array<i32>} : memref<1x4xf32, #tpu.memory_space<vmem>>, vector<1x4xf32>,
    return
  }
  func.func @transform_0(%arg0: i32) -> (i32, i32) {
    %c0_i32 = arith.constant 0 : i32
    %c0_i32_0 = arith.constant 0 : i32
    return %arg0, %c0_i32 : i32, i32
  }
  func.func @transform_1(%arg0: i32) -> (i32, i32) {
    %c0_i32 = arith.constant 0 : i32
    %c0_i32_0 = arith.constant 0 : i32
    return %arg0, %c0_i32 : i32, i32
  }
  func.func @transform_2(%arg0: i32) -> (i32, i32) {
    %c0_i32 = arith.constant 0 : i32
    %c0_i32_0 = arith.constant 0 : i32
    return %arg0, %c0_i32 : i32, i32
  }
  func.func @transform_3(%arg0: i32) -> (i32, i32) {
    %c0_i32 = arith.constant 0 : i32
    %c0_i32_0 = arith.constant 0 : i32
    %c0_i32_1 = arith.constant 0 : i32
    return %c0_i32, %c0_i32_0 : i32, i32
  }
  func.func @transform_4(%arg0: i32) -> (i32, i32) {
    %c0_i32 = arith.constant 0 : i32
    %c0_i32_0 = arith.constant 0 : i32
    %c0_i32_1 = arith.constant 0 : i32
    return %c0_i32, %c0_i32_0 : i32, i32
  }
  func.func @transform_5(%arg0: i32) -> (i32, i32) {
    %c0_i32 = arith.constant 0 : i32
    %c0_i32_0 = arith.constant 0 : i32
    %c0_i32_1 = arith.constant 0 : i32
    return %c0_i32, %c0_i32_0 : i32, i32
  }
  func.func @transform_6(%arg0: i32) -> (i32, i32) {
    %c0_i32 = arith.constant 0 : i32
    %c0_i32_0 = arith.constant 0 : i32
    %c0_i32_1 = arith.constant 0 : i32
    return %c0_i32, %c0_i32_0 : i32, i32
  }
  func.func @transform_7(%arg0: i32) -> (i32, i32) {
    %c0_i32 = arith.constant 0 : i32
    %c0_i32_0 = arith.constant 0 : i32
    %c0_i32_1 = arith.constant 0 : i32
    return %c0_i32, %c0_i32_0 : i32, i32
  }
  func.func @transform_8(%arg0: i32) -> (i32, i32) {
    %c0_i32 = arith.constant 0 : i32
    %c0_i32_0 = arith.constant 0 : i32
    %c0_i32_1 = arith.constant 0 : i32
    return %c0_i32, %c0_i32_0 : i32, i32
  }
  func.func @transform_9(%arg0: i32) -> (i32, i32) {
    %c0_i32 = arith.constant 0 : i32
    %c0_i32_0 = arith.constant 0 : i32
    %c0_i32_1 = arith.constant 0 : i32
    return %c0_i32, %c0_i32_0 : i32, i32
  }
  func.func @transform_10(%arg0: i32) -> (i32, i32) {
    %c0_i32 = arith.constant 0 : i32
    %c0_i32_0 = arith.constant 0 : i32
    return %c0_i32, %arg0 : i32, i32
  }
}

</mosaic_0001>

<bundles_post_ra>
// kernel: tpu_custom_call.1
= control target key start
LH: loop header
LB: loop body
LE: loop exit
PB: predicated region body
PF: predicated region fallthrough
CT: control target
= control target key end

     0   :  { %v1530_v2 = vmov 0   ;;  %s1915_s0 = inlined_call_operand.vmem [shape: f32[4,768], index: 0, kind: input, shape index: {}]   ;;  %s1916_s1 = inlined_call_operand.vmem [shape: f32[4,768], index: 1, kind: input, shape index: {}]   ;;  %s1917_s2 = inlined_call_operand.vmem [shape: f32[4,2], index: 2, kind: input, shape index: {}]   ;;  %s1918_s3 = inlined_call_operand.vmem [shape: bf16[768,32], index: 3, kind: input, shape index: {}]   ;;  %s1919_s4 = inlined_call_operand.vmem [shape: bf16[768,32], index: 4, kind: input, shape index: {}]   ;;  %s1920_s5 = inlined_call_operand.vmem [shape: f32[1,32], index: 5, kind: input, shape index: {}]   ;;  %s1921_s6 = inlined_call_operand.vmem [shape: f32[1,32], index: 6, kind: input, shape index: {}]   ;;  %s1922_s7 = inlined_call_operand.vmem [shape: f32[1,32], index: 7, kind: input, shape index: {}]   ;;  %s1923_s8 = inlined_call_operand.vmem [shape: f32[1,32], index: 8, kind: input, shape index: {}]   ;;  %s1924_s9 = inlined_call_operand.<no memory space> [shape: f32[1,1], index: 9, kind: input, shape index: {}]   ;;  %s1925_s10 = inlined_call_operand.hbm [shape: f32[1,4], index: 10, kind: output, shape index: {}]  }
   0x1   :  { %v1402_v0 = vld [vmem:[%s1919_s4 + $0x78] sm:$0xff]   ;;  %1400 = vset.pattern.permute.xlu0 %v1530_v2  ;;  %v1406_v5 = vld [vmem:[%s1919_s4 + $0x70] sm:$0xff]   ;;  %v1410_v9 = vld [vmem:[%s1919_s4 + $0x68] sm:$0xff]  }
   0x2   :  { %v1403_v1 = vld [vmem:[%s1919_s4 + $0xf8] sm:$0xff]   ;;  %1265 = vmatprep.subr.bf16.mxu0 %v1402_v0  ;;  %v1407_v6 = vld [vmem:[%s1919_s4 + $0xf0] sm:$0xff]   ;;  %v1411_v10 = vld [vmem:[%s1919_s4 + $0xe8] sm:$0xff]  }
   0x3   :  { %v1404_v3 = vld [vmem:[%s1919_s4 + $0x38] sm:$0xff]   ;;  %1287 = vmatprep.subr.bf16.mxu1 %v1403_v1  ;;  %v1408_v7 = vld [vmem:[%s1919_s4 + $0x30] sm:$0xff]   ;;  %v1412_v11 = vld [vmem:[%s1919_s4 + $0x28] sm:$0xff]  }
   0x4   :  { %v1405_v4 = vld [vmem:[%s1919_s4 + $0xb8] sm:$0xff]   ;;  %1266 = vmatpush3.bf16.msra.mxu0 %v1404_v3  ;;  %v1409_v8 = vld [vmem:[%s1919_s4 + $0xb0] sm:$0xff]   ;;  %v1413_v12 = vld [vmem:[%s1919_s4 + $0xa8] sm:$0xff]  }
   0x5   :  { %1288 = vmatpush3.bf16.msra.mxu1 %v1405_v4  ;;  %1267 = vmatprep.subr.bf16.mxu0 %v1406_v5  ;;  %v1414_v13 = vld [vmem:[%s1919_s4 + $0x60] sm:$0xff]   ;;  %v1418_v17 = vld [vmem:[%s1919_s4 + $0x58] sm:$0xff]   ;;  %v1422_v21 = vld [vmem:[%s1919_s4 + $0x50] sm:$0xff]  }
   0x6   :  { %1289 = vmatprep.subr.bf16.mxu1 %v1407_v6  ;;  %v1415_v14 = vld [vmem:[%s1919_s4 + $0xe0] sm:$0xff]   ;;  %v1419_v18 = vld [vmem:[%s1919_s4 + $0xd8] sm:$0xff]   ;;  %v1423_v22 = vld [vmem:[%s1919_s4 + $0xd0] sm:$0xff]  }
   0x7   :  { %v1416_v15 = vld [vmem:[%s1919_s4 + $0x20] sm:$0xff]   ;;  %v1420_v19 = vld [vmem:[%s1919_s4 + $0x18] sm:$0xff]   ;;  %v1424_v23 = vld [vmem:[%s1919_s4 + $0x10] sm:$0xff]  }
   0x8   :  { %1268 = vmatpush3.bf16.msra.mxu0 %v1408_v7  ;;  %v1417_v16 = vld [vmem:[%s1919_s4 + $0xa0] sm:$0xff]   ;;  %v1421_v20 = vld [vmem:[%s1919_s4 + $0x98] sm:$0xff]   ;;  %v1425_v24 = vld [vmem:[%s1919_s4 + $0x90] sm:$0xff]  }
   0x9   :  { %1290 = vmatpush3.bf16.msra.mxu1 %v1409_v8  ;;  %1269 = vmatprep.subr.bf16.mxu0 %v1410_v9  ;;  %v1426_v25 = vld [vmem:[%s1919_s4 + $0x48] sm:$0xff]   ;;  %v1430_v29 = vld [vmem:[%s1919_s4 + $0x40] sm:$0xff]   ;;  %v1436_v37 = vld [vmem:[%s1919_s4 + $0x178] sm:$0xff]  }
   0xa   :  { %1291 = vmatprep.subr.bf16.mxu1 %v1411_v10  ;;  %v1427_v26 = vld [vmem:[%s1919_s4 + $0xc8] sm:$0xff]   ;;  %v1431_v30 = vld [vmem:[%s1919_s4 + $0xc0] sm:$0xff]   ;;  %v1437_v40 = vld [vmem:[%s1918_s3 + $0x78] sm:$0xff]  }
   0xb   :  { %v1428_v27 = vld [vmem:[%s1919_s4 + $0x8] sm:$0xff]   ;;  %v1432_v31 = vld [vmem:[%s1919_s4] sm:$0xff]   ;;  %v1438_v43 = vld [vmem:[%s1919_s4 + $0x138] sm:$0xff]  }
   0xc   :  { %1270 = vmatpush3.bf16.msra.mxu0 %v1412_v11  ;;  %v1429_v28 = vld [vmem:[%s1919_s4 + $0x88] sm:$0xff]   ;;  %v1433_v32 = vld [vmem:[%s1919_s4 + $0x80] sm:$0xff]   ;;  %v1439_v44 = vld [vmem:[%s1918_s3 + $0x38] sm:$0xff]  }
   0xd   :  { %1292 = vmatpush3.bf16.msra.mxu1 %v1413_v12  ;;  %1271 = vmatprep.subr.bf16.mxu0 %v1414_v13  ;;  %v152_v33 = vld [vmem:[%s1916_s1] sm:$0xff]  ;;  %v153_v34 = vld [vmem:[%s1916_s1 + $0x8] sm:$0xff]  ;;  %v1440_v45 = vld [vmem:[%s1919_s4 + $0x170] sm:$0xff]  }
   0xe   :  { %1293 = vmatprep.subr.bf16.mxu1 %v1415_v14  ;;  %v158_v35 = vcombine.high %v152_v33, %v152_v33  ;;  %v159_v36 = vcombine.high %v153_v34, %v153_v34  ;;  %v164_v38 = vpack.c.bf16 %v152_v33, %v152_v33  ;;  %v166_v39 = vpack.c.bf16 %v153_v34, %v153_v34  ;;  %v1441_v46 = vld [vmem:[%s1918_s3 + $0x70] sm:$0xff]   ;;  %v1444_v49 = vld [vmem:[%s1919_s4 + $0x168] sm:$0xff]   ;;  %v1448_v53 = vld [vmem:[%s1919_s4 + $0x160] sm:$0xff]  }
   0xf   :  { %v1442_v47 = vld [vmem:[%s1919_s4 + $0x130] sm:$0xff]   ;;  %v1445_v50 = vld [vmem:[%s1918_s3 + $0x68] sm:$0xff]   ;;  %v1449_v54 = vld [vmem:[%s1918_s3 + $0x60] sm:$0xff]  }
  0x10   :  { %1272 = vmatpush3.bf16.msra.mxu0 %v1416_v15  ;;  %v165_v41 = vpack.c.bf16 %v158_v35, %v158_v35  ;;  %v167_v42 = vpack.c.bf16 %v159_v36, %v159_v36  ;;  %v1443_v48 = vld [vmem:[%s1918_s3 + $0x30] sm:$0xff]   ;;  %v1446_v51 = vld [vmem:[%s1919_s4 + $0x128] sm:$0xff]   ;;  %v1450_v55 = vld [vmem:[%s1919_s4 + $0x120] sm:$0xff]  }
  0x11   :  { %1294 = vmatpush3.bf16.msra.mxu1 %v1417_v16  ;;  %1273 = vmatprep.subr.bf16.mxu0 %v1418_v17  ;;  %v1447_v52 = vld [vmem:[%s1918_s3 + $0x28] sm:$0xff]   ;;  %v1451_v56 = vld [vmem:[%s1918_s3 + $0x20] sm:$0xff]   ;;  %v1452_v57 = vld [vmem:[%s1919_s4 + $0x158] sm:$0xff]  }
  0x12   :  { %1295 = vmatprep.subr.bf16.mxu1 %v1419_v18  ;;  %586 = vmatprep.mubr.bf16.mxu0 %v165_v41  ;;  %v1453_v58 = vld [vmem:[%s1918_s3 + $0x58] sm:$0xff]   ;;  %v1456_v61 = vld [vmem:[%s1919_s4 + $0x150] sm:$0xff]   ;;  %v1460_v1 = vld [vmem:[%s1919_s4 + $0x148] sm:$0xff]  }
  0x13   :  { %626 = vmatprep.mubr.bf16.mxu1 %v167_v42  ;;  %v1454_v59 = vld [vmem:[%s1919_s4 + $0x118] sm:$0xff]   ;;  %v1457_v62 = vld [vmem:[%s1918_s3 + $0x50] sm:$0xff]   ;;  %v1461_v2 = vld [vmem:[%s1918_s3 + $0x48] sm:$0xff]  }
  0x14   :  { %1274 = vmatpush3.bf16.msra.mxu0 %v1420_v19  ;;  %v1455_v60 = vld [vmem:[%s1918_s3 + $0x18] sm:$0xff]   ;;  %v1458_v63 = vld [vmem:[%s1919_s4 + $0x110] sm:$0xff]   ;;  %v1462_v3 = vld [vmem:[%s1919_s4 + $0x108] sm:$0xff]  }
  0x15   :  { %1296 = vmatpush3.bf16.msra.mxu1 %v1421_v20  ;;  %1275 = vmatprep.subr.bf16.mxu0 %v1422_v21  ;;  %v1459_v0 = vld [vmem:[%s1918_s3 + $0x10] sm:$0xff]   ;;  %v1463_v4 = vld [vmem:[%s1918_s3 + $0x8] sm:$0xff]   ;;  %v1464_v5 = vld [vmem:[%s1919_s4 + $0x140] sm:$0xff]  }
  0x16   :  { %1297 = vmatprep.subr.bf16.mxu1 %v1423_v22  ;;  %v1465_v6 = vld [vmem:[%s1918_s3 + $0x40] sm:$0xff]   ;;  %v154_v9 = vld [vmem:[%s1916_s1 + $0x10] sm:$0xff]  ;;  %v1470_v14 = vld [vmem:[%s1918_s3 + $0xf8] sm:$0xff]  }
  0x17   :  { %v1466_v7 = vld [vmem:[%s1919_s4 + $0x100] sm:$0xff]   ;;  %v160_v10 = vcombine.high %v154_v9, %v154_v9  ;;  %v168_v12 = vpack.c.bf16 %v154_v9, %v154_v9  ;;  %v1471_v17 = vld [vmem:[%s1918_s3 + $0x178] sm:$0xff]   ;;  %v1474_v21 = vld [vmem:[%s1918_s3 + $0xf0] sm:$0xff]  }
  0x18   :  { %1276 = vmatpush3.bf16.msra.mxu0 %v1424_v23  ;;  %v1467_v8 = vld [vmem:[%s1918_s3] sm:$0xff]   ;;  %v1472_v19 = vld [vmem:[%s1918_s3 + $0xb8] sm:$0xff]   ;;  %v1475_v22 = vld [vmem:[%s1918_s3 + $0x170] sm:$0xff]  }
  0x19   :  { %1298 = vmatpush3.bf16.msra.mxu1 %v1425_v24  ;;  %1277 = vmatprep.subr.bf16.mxu0 %v1426_v25  ;;  %v38_v11 = vld [vmem:[%s1915_s0] sm:$0xff]  ;;  %v169_v15 = vpack.c.bf16 %v160_v10, %v160_v10  ;;  %v1473_v20 = vld [vmem:[%s1918_s3 + $0x138] sm:$0xff]   ;;  %v1476_v23 = vld [vmem:[%s1918_s3 + $0xb0] sm:$0xff]  }
  0x1a   :  { %1299 = vmatprep.subr.bf16.mxu1 %v1427_v26  ;;  %v44_v13 = vcombine.high %v38_v11, %v38_v11  ;;  %v50_v16 = vpack.c.bf16 %v38_v11, %v38_v11  ;;  %v1477_v24 = vld [vmem:[%s1918_s3 + $0x130] sm:$0xff]   ;;  %v1478_v25 = vld [vmem:[%s1918_s3 + $0xe8] sm:$0xff]   ;;  %v1486_v33 = vld [vmem:[%s1918_s3 + $0xd8] sm:$0xff]  }
  0x1b   :  { %v1479_v26 = vld [vmem:[%s1918_s3 + $0x168] sm:$0xff]   ;;  %v1487_v34 = vld [vmem:[%s1918_s3 + $0x158] sm:$0xff]  }
  0x1c   :  { %1278 = vmatpush3.bf16.msra.mxu0 %v1428_v27  ;;  %v51_v18 = vpack.c.bf16 %v44_v13, %v44_v13  ;;  %v1480_v27 = vld [vmem:[%s1918_s3 + $0xa8] sm:$0xff]   ;;  %v1488_v35 = vld [vmem:[%s1918_s3 + $0x98] sm:$0xff]  }
  0x1d   :  { %1300 = vmatpush3.bf16.msra.mxu1 %v1429_v28  ;;  %1279 = vmatprep.subr.bf16.mxu0 %v1430_v29  ;;  %v1481_v28 = vld [vmem:[%s1918_s3 + $0x128] sm:$0xff]   ;;  %v1482_v29 = vld [vmem:[%s1918_s3 + $0xe0] sm:$0xff]   ;;  %v1489_v36 = vld [vmem:[%s1918_s3 + $0x118] sm:$0xff]  }
  0x1e   :  { %1301 = vmatprep.subr.bf16.mxu1 %v1431_v30  ;;  %v1483_v30 = vld [vmem:[%s1918_s3 + $0x160] sm:$0xff]   ;;  %v1494_v41 = vld [vmem:[%s1918_s3 + $0xc8] sm:$0xff]  }
  0x1f   :  { %v1495_v42 = vld [vmem:[%s1918_s3 + $0x148] sm:$0xff]  }
  0x20   :  { %1280 = vmatpush3.bf16.msra.mxu0 %v1432_v31  ;;  %v1484_v31 = vld [vmem:[%s1918_s3 + $0xa0] sm:$0xff]  }
  0x21   :  { %1302 = vmatpush3.bf16.msra.mxu1 %v1433_v32  ;;  %1309 = vmatprep.subr.bf16.mxu0 %v1436_v37  ;;  %v1485_v32 = vld [vmem:[%s1918_s3 + $0x120] sm:$0xff]   ;;  %v1490_v37 = vld [vmem:[%s1918_s3 + $0xd0] sm:$0xff]  }
  0x22   :  { %1331 = vmatprep.subr.bf16.mxu1 %v1437_v40  ;;  %v1493_v40 = vld [vmem:[%s1918_s3 + $0x110] sm:$0xff]  }
  0x23   :  { %587 = vmatmul.mubr.bf16.vlgmr.msra.gmra.mxu0 %v164_v38  ;;  %v1491_v38 = vld [vmem:[%s1918_s3 + $0x150] sm:$0xff]  }
  0x24   :  { %627 = vmatmul.mubr.bf16.vlgmr.msra.gmra.mxu1 %v166_v39  ;;  %1310 = vmatpush3.bf16.msra.mxu0 %v1438_v43  ;;  %v1492_v39 = vld [vmem:[%s1918_s3 + $0x90] sm:$0xff]   ;;  %v1496_v43 = vld [vmem:[%s1918_s3 + $0x88] sm:$0xff]  }
  0x25   :  { %1332 = vmatpush3.bf16.msra.mxu1 %v1439_v44  ;;  %1311 = vmatprep.subr.bf16.mxu0 %v1440_v45  ;;  %v1497_v44 = vld [vmem:[%s1918_s3 + $0x108] sm:$0xff]   ;;  %v1498_v45 = vld [vmem:[%s1918_s3 + $0xc0] sm:$0xff]  }
  0x26   :  { %1333 = vmatprep.subr.bf16.mxu1 %v1441_v46  ;;  %666 = vmatprep.mubr.bf16.mxu0 %v169_v15  ;;  %v1499_v46 = vld [vmem:[%s1918_s3 + $0x140] sm:$0xff]  }
  0x27   :  { %994 = vmatprep.mubr.bf16.mxu1 %v51_v18 }
  0x28   :  { %1312 = vmatpush3.bf16.msra.mxu0 %v1442_v47  ;;  %v1500_v47 = vld [vmem:[%s1918_s3 + $0x80] sm:$0xff]  }
  0x29   :  { %1334 = vmatpush3.bf16.msra.mxu1 %v1443_v48  ;;  %1313 = vmatprep.subr.bf16.mxu0 %v1444_v49  ;;  %v1501_v48 = vld [vmem:[%s1918_s3 + $0x100] sm:$0xff]   ;;  %v39_v49 = vld [vmem:[%s1915_s0 + $0x8] sm:$0xff] }
  0x2a   :  { %1335 = vmatprep.subr.bf16.mxu1 %v1445_v50  ;;  %v40_v50 = vld [vmem:[%s1915_s0 + $0x10] sm:$0xff] }
  0x2c   :  { %1314 = vmatpush3.bf16.msra.mxu0 %v1446_v51  ;;  %v45_v51 = vcombine.high %v39_v49, %v39_v49 }
  0x2d   :  { %1336 = vmatpush3.bf16.msra.mxu1 %v1447_v52  ;;  %1315 = vmatprep.subr.bf16.mxu0 %v1448_v53  ;;  %v46_v52 = vcombine.high %v40_v50, %v40_v50  ;;  %v1082_v53 = vld [vmem:[%s1917_s2] sm:$0xf] }
  0x2e   :  { %1337 = vmatprep.subr.bf16.mxu1 %v1449_v54 }
  0x30   :  { %1316 = vmatpush3.bf16.msra.mxu0 %v1450_v55 }
  0x31   :  { %1338 = vmatpush3.bf16.msra.mxu1 %v1451_v56  ;;  %1317 = vmatprep.subr.bf16.mxu0 %v1452_v57 }
  0x32   :  { %1339 = vmatprep.subr.bf16.mxu1 %v1453_v58 }
  0x34   :  { %1318 = vmatpush3.bf16.msra.mxu0 %v1454_v59 }
  0x35   :  { %1340 = vmatpush3.bf16.msra.mxu1 %v1455_v60  ;;  %1319 = vmatprep.subr.bf16.mxu0 %v1456_v61 }
  0x36   :  { %1341 = vmatprep.subr.bf16.mxu1 %v1457_v62 }
  0x38   :  { %1320 = vmatpush3.bf16.msra.mxu0 %v1458_v63 }
  0x39   :  { %1342 = vmatpush3.bf16.msra.mxu1 %v1459_v0  ;;  %1321 = vmatprep.subr.bf16.mxu0 %v1460_v1 }
  0x3a   :  { %1343 = vmatprep.subr.bf16.mxu1 %v1461_v2 }
  0x3c   :  { %1322 = vmatpush3.bf16.msra.mxu0 %v1462_v3 }
  0x3d   :  { %1344 = vmatpush3.bf16.msra.mxu1 %v1463_v4  ;;  %1323 = vmatprep.subr.bf16.mxu0 %v1464_v5 }
  0x3e   :  { %1345 = vmatprep.subr.bf16.mxu1 %v1465_v6 }
  0x40   :  { %1324 = vmatpush3.bf16.msra.mxu0 %v1466_v7 }
  0x41   :  { %1346 = vmatpush3.bf16.msra.mxu1 %v1467_v8  ;;  %1353 = vmatprep.subr.bf16.mxu0 %v1470_v14 }
  0x42   :  { %1375 = vmatprep.subr.bf16.mxu1 %v1471_v17 }
  0x43   :  { %667 = vmatmul.mubr.bf16.vlgmr.msra.gmra.mxu0 %v168_v12 }
  0x44   :  { %995 = vmatmul.mubr.bf16.vlgmr.msra.gmra.mxu1 %v50_v16  ;;  %1354 = vmatpush3.bf16.msra.mxu0 %v1472_v19 }
  0x45   :  { %1376 = vmatpush3.bf16.msra.mxu1 %v1473_v20  ;;  %1355 = vmatprep.subr.bf16.mxu0 %v1474_v21 }
  0x46   :  { %1377 = vmatprep.subr.bf16.mxu1 %v1475_v22 }
  0x48   :  { %1356 = vmatpush3.bf16.msra.mxu0 %v1476_v23 }
  0x49   :  { %1378 = vmatpush3.bf16.msra.mxu1 %v1477_v24  ;;  %1357 = vmatprep.subr.bf16.mxu0 %v1478_v25 }
  0x4a   :  { %1379 = vmatprep.subr.bf16.mxu1 %v1479_v26 }
  0x4c   :  { %1358 = vmatpush3.bf16.msra.mxu0 %v1480_v27 }
  0x4d   :  { %1380 = vmatpush3.bf16.msra.mxu1 %v1481_v28  ;;  %1359 = vmatprep.subr.bf16.mxu0 %v1482_v29 }
  0x4e   :  { %1381 = vmatprep.subr.bf16.mxu1 %v1483_v30 }
  0x50   :  { %1360 = vmatpush3.bf16.msra.mxu0 %v1484_v31 }
  0x51   :  { %1382 = vmatpush3.bf16.msra.mxu1 %v1485_v32  ;;  %1361 = vmatprep.subr.bf16.mxu0 %v1486_v33 }
  0x52   :  { %1383 = vmatprep.subr.bf16.mxu1 %v1487_v34 }
  0x54   :  { %1362 = vmatpush3.bf16.msra.mxu0 %v1488_v35 }
  0x55   :  { %1384 = vmatpush3.bf16.msra.mxu1 %v1489_v36  ;;  %1363 = vmatprep.subr.bf16.mxu0 %v1490_v37 }
  0x56   :  { %1385 = vmatprep.subr.bf16.mxu1 %v1491_v38 }
  0x58   :  { %1364 = vmatpush3.bf16.msra.mxu0 %v1492_v39 }
  0x59   :  { %1386 = vmatpush3.bf16.msra.mxu1 %v1493_v40  ;;  %1365 = vmatprep.subr.bf16.mxu0 %v1494_v41 }
  0x5a   :  { %1387 = vmatprep.subr.bf16.mxu1 %v1495_v42 }
  0x5c   :  { %1366 = vmatpush3.bf16.msra.mxu0 %v1496_v43 }
  0x5d   :  { %1388 = vmatpush3.bf16.msra.mxu1 %v1497_v44  ;;  %1367 = vmatprep.subr.bf16.mxu0 %v1498_v45 }
  0x5e   :  { %1389 = vmatprep.subr.bf16.mxu1 %v1499_v46 }
  0x5f   :  { %16 = vsyncpa [#allocation4], 0  ;;  %v52_v54 = vpack.c.bf16 %v39_v49, %v39_v49  ;;  %v54_v55 = vpack.c.bf16 %v40_v50, %v40_v50  ;;  %1094 = vperm.xlu0 %1400, %v1082_v53   ;;  %v53_v56 = vpack.c.bf16 %v45_v51, %v45_v51  ;;  %v55_v57 = vpack.c.bf16 %v46_v52, %v46_v52  ;;  %v1260_v29 = vld [vmem:[%s1920_s5] ss:$0 sm:$0xff] }
  0x60   :  { %1368 = vmatpush3.bf16.msra.mxu0 %v1500_v47  ;;  %v1531_v58 = vmov 1   ;;  %v1261_v30 = vld [vmem:[%s1921_s6] ss:$0 sm:$0xff]  ;;  %vm1127_vm0 = vcmask 257024   ;;  %v1132_v44 = vstv %s1924_s9  ;;  %v1141_v50 = vlaneseq }
  0x61   :  { %1390 = vmatpush3.bf16.msra.mxu1 %v1501_v48  ;;  %1034 = vmatprep.mubr.bf16.mxu0 %v53_v56  ;;  %v1262_v33 = vld [vmem:[%s1922_s7] ss:$0 sm:$0xff]  ;;  %s1532_s7 = smov [#allocation3]   ;;  %vm1148_vm1 = vcmask 24576  }
  0x62   :  { %1074 = vmatprep.mubr.bf16.mxu1 %v55_v57  ;;  %v1263_v40 = vld [vmem:[%s1923_s8] ss:$0 sm:$0xff]  ;;  %v1142_v51 = vand.u32 127, %v1141_v50  ;;  %v1144_v52 = vshrl.u32 %v1141_v50, 7  ;;  %s1156_s8 = sshll.u32 %s1532_s7, 4  ;;  %s1157_s8 = int_to_ptr.vmem [resolvable:$true] %s1156_s8 }
  0x63   :  { %1035 = vmatmul.mubr.bf16.vlgmr.msra.gmra.mxu0 %v52_v54  ;;  %1401 = vset.pattern.permute.xlu0 %v1531_v58  ;;  %s1508_s16 = scalar_lea.vmem %s1157_s8, 16  ;;  %s1512_s9 = scalar_lea.vmem %s1157_s8, 32 }
  0x64   :  { %1075 = vmatmul.mubr.bf16.vlgmr.msra.gmra.mxu1 %v54_v55  ;;  %1107 = vperm.xlu0 %1401, %v1082_v53   ;;  %v1145_v53 = vsub.s32 %v1142_v51, %v1144_v52  ;;  %p1509_p0 = scmp.ne.s32.totalorder %s1157_s8, %s1508_s16  ;;  %p1513_p1 = scmp.lt.s32.totalorder %s1157_s8, %s1157_s8 }
  0x65   :  { %p1514_p2 = scmp.lt.s32.totalorder %s1512_s9, %s1508_s16 }
  0x67   :  { %p1515_p3 = por %p1514_p2, %p1513_p1 }
  0x69   :  { %p1516_p4 = pnand %p1515_p3, %p1509_p0 }
  0xda   :  { %v1095_v17 = vpop.permute.xlu0 %1094 }
  0xdb   :  { %v1103_v36 = vmul.f32 %v1261_v30, %v1095_v17 }
  0xdf   :  { %v1108_v28 = vpop.permute.xlu0 %1107 }
  0xe0   :  { %v1116_v37 = vmul.f32 %v1262_v33, %v1108_v28 }
  0xe3   :  { %v1281_v59 = vpop.f32.mrf.mxu0 }
  0xe4   :  { %v1303_v60 = vpop.f32.mrf.mxu1 }
  0xe5   :  { %v1282_v61 = vpop.f32.mrf.mxu0 }
  0xe6   :  { %v1304_v62 = vpop.f32.mrf.mxu1  ;;  %v1283_v11 = vadd.f32 %v1282_v61, %v1281_v59 }
  0xe7   :  { %v1284_v63 = vpop.f32.mrf.mxu0  ;;  %v1305_v12 = vadd.f32 %v1304_v62, %v1303_v60 }
  0xe8   :  { %v1306_v0 = vpop.f32.mrf.mxu1 }
  0xe9   :  { %v1285_v1 = vpop.f32.mrf.mxu0  ;;  %v629_v14 = vadd.f32 %v1305_v12, %v1283_v11 }
  0xea   :  { %v1307_v2 = vpop.f32.mrf.mxu1 }
 0x103   :  { %v1325_v3 = vpop.f32.mrf.mxu0 }
 0x104   :  { %v1347_v4 = vpop.f32.mrf.mxu1 }
 0x105   :  { %v1326_v5 = vpop.f32.mrf.mxu0 }
 0x106   :  { %v1348_v6 = vpop.f32.mrf.mxu1  ;;  %v1327_v13 = vadd.f32 %v1326_v5, %v1325_v3 }
 0x107   :  { %v1328_v7 = vpop.f32.mrf.mxu0  ;;  %v1349_v16 = vadd.f32 %v1348_v6, %v1347_v4 }
 0x108   :  { %v1350_v8 = vpop.f32.mrf.mxu1  ;;  %v669_v15 = vadd.f32 %v1327_v13, %v629_v14 }
 0x109   :  { %v1329_v9 = vpop.f32.mrf.mxu0 }
 0x10a   :  { %v1351_v10 = vpop.f32.mrf.mxu1  ;;  %v997_v22 = vadd.f32 %v1349_v16, %v669_v15 }
 0x123   :  { %v1369_v18 = vpop.f32.mrf.mxu0 }
 0x124   :  { %v1391_v19 = vpop.f32.mrf.mxu1 }
 0x125   :  { %v1370_v20 = vpop.f32.mrf.mxu0 }
 0x126   :  { %v1392_v21 = vpop.f32.mrf.mxu1  ;;  %v1371_v23 = vadd.f32 %v1370_v20, %v1369_v18 }
 0x127   :  { %v1372_v24 = vpop.f32.mrf.mxu0  ;;  %v1393_v27 = vadd.f32 %v1392_v21, %v1391_v19 }
 0x128   :  { %v1394_v25 = vpop.f32.mrf.mxu1  ;;  %v1037_v26 = vadd.f32 %v1371_v23, %v997_v22 }
 0x129   :  { %v1373_v31 = vpop.f32.mrf.mxu0 }
 0x12a   :  { %v1395_v32 = vpop.f32.mrf.mxu1  ;;  %v1077_v34 = vadd.f32 %v1393_v27, %v1037_v26 }
 0x12c   :  { %v1090_v35 = vadd.f32 %v1260_v29, %v1077_v34 }
 0x12e   :  { %v1104_v38 = vadd.f32 %v1103_v36, %v1090_v35 }
 0x130   :  { %v1117_v39 = vadd.f32 %v1116_v37, %v1104_v38 }
 0x132   :  { %v1118_v41 = vmax.f32 %v1117_v39, 0.0 }
 0x134   :  { %v1126_v42 = vmul.f32 %v1263_v40, %v1118_v41 }
 0x136   :  { %v1128_v43 = vsel %vm1127_vm0, %v1126_v42, 0.0 }
 0x137   :  { %1129 = vadd.xlane.f32.xlu1 %v1128_v43 }
 0x1c0   :  { %v1130_v45 = vpop.xlane.xlu1 %1129 }
 0x1c1   :  { %v1133_v46 = vadd.f32 %v1132_v44, %v1130_v45 }
 0x1c3   :  { %v1264_v47 = vmul.f32 -1.442695, %v1133_v46 }
 0x1c5   :  { %1504 = vpow2.f32 %v1264_v47 }
 0x1d2   :  { %v1505_v48 = vpop.eup %1504 }
 0x1d3   :  { %v1137_v49 = vadd.f32 1.0, %v1505_v48 }
 0x1d5   :  { %1506 = vrcp.f32 %v1137_v49 }
 0x1e2   :  { %v1507_v54 = vpop.eup %1506 }
 0x1e3   :  { %v1146_v55 = vrot.slane %v1507_v54, %v1145_v53 }
 0x1e5   :  { %1149 = vst.msk [vmem:[#allocation3] sm:$0x1] %vm1148_vm1, %v1146_v55 }
 0x1e6   :  { %1519 = shalt.err (!%p1516_p4)
}
 0x1e7   :  { %1159 = dma.vmem_to_hbm [thread:$0]  %s1157_s8, 16, %s1925_s10, [#allocation4]  }
 0x1e8   :  { %1528 = dma.done.wait [#allocation4], 16  }
 0x1e9   :  { %1529 = vsyncadd [#allocation4], 4294967280 }
 0x1ea   :  { %1163 = vsyncpa [#allocation4], 1 }

</bundles_post_ra>
